<compile_context>
chip_gen: v7x
topology: tpu7x:2x2x1
jax: 0.10.0
libtpu: 0.0.40
codegen_flags: <defaults>
</compile_context>

<pallas_src>
import jax
import jax.numpy as jnp
from jax.experimental import pallas as pl
from jax.experimental.pallas import tpu as pltpu

LP = 128  # lane-dense padded label dimension (out_proj has only 2 labels)


def _round_up(x, m):
    return ((x + m - 1) // m) * m


def _choose_batch_tile(B, block_b=512):
    """Pick (tile_rows, n_steps): steps first so per-step padding stays <8 rows,
    even #steps for v7x megacore when there is enough work, and a 256-row MXU
    alignment (v6e/v7x) only when it does not blow up padding."""
    n_steps = max(1, pl.cdiv(B, block_b))
    if B >= 512 and n_steps % 2 == 1:
        n_steps += 1                              # keep both v7x TCs busy
    tb = _round_up(pl.cdiv(B, n_steps), 8)        # <8 rows of padding per step
    if tb % 256:
        tb256 = _round_up(tb, 256)
        if n_steps * tb256 - B <= max(32, B // 8):  # cheap enough -> MXU-align
            tb = tb256
    return tb, n_steps


def _head_kernel(x_ref, wd_ref, bd_ref, wo_ref, bo_ref, out_ref):
    # x_ref:   [TB, H]   f32   CLS-token activations (batch tile, cast here)
    # wd_ref:  [H, H]    bf16  dense.weight^T    (VMEM-resident across tiles)
    # bd_ref:  [1, H]    f32   dense.bias
    # wo_ref:  [H, 128]  bf16  out_proj.weight^T, zero-padded to lane width
    # bo_ref:  [1, 128]  f32   out_proj.bias,     zero-padded
    # out_ref: [TB, 128] bf16  lane-dense logits block
    # TODO(synk): dropout is identity in eval mode; no stochastic dropout here.
    x = x_ref[...].astype(jnp.bfloat16)                  # bf16 MXU operand
    h = jnp.dot(x, wd_ref[...], preferred_element_type=jnp.float32)
    h = jnp.tanh(h + bd_ref[...])                        # f32 bias + tanh (EUP)
    y = jnp.dot(h.astype(jnp.bfloat16), wo_ref[...],
                preferred_element_type=jnp.float32)
    out_ref[...] = (y + bo_ref[...]).astype(out_ref.dtype)


def prepare_head_params(wd, bd, wo, bo):
    """One-time (model-load) weight prep: bf16 cast, 128-lane pad, bias reshape.
    wd: [H, H] dense.weight^T; bd: [H]; wo: [H, L] out_proj.weight^T; bo: [L]."""
    H, L = wo.shape
    assert L <= LP, f"out_proj labels ({L}) must be <= padded lane width {LP}"
    wd_bf16 = wd.astype(jnp.bfloat16)
    wo_pad = jnp.pad(wo.astype(jnp.bfloat16), ((0, 0), (0, LP - L)))
    bd2 = bd.astype(jnp.float32).reshape(1, H)
    bo_pad = jnp.pad(bo.astype(jnp.float32), (0, LP - L)).reshape(1, LP)
    return wd_bf16, bd2, wo_pad, bo_pad, L


def roberta_classification_head(features, params, *, block_b=512):
    """features: [B, S, H] f32; params from prepare_head_params -> [B, L] f32."""
    wd_bf16, bd2, wo_pad, bo_pad, L = params
    B, S, H = features.shape
    assert H % 128 == 0, "hidden size must be a multiple of the 128-lane width"

    # Free view (no copy, no cast): the x BlockSpec reads only columns [0:H]
    # of each row, i.e. only seq position 0 (the CLS token) of the f32 input.
    x2d = features.reshape(B, S * H)

    tb, n_steps = _choose_batch_tile(B, block_b)
    b_pad = tb * n_steps   # output rows; input-overhang reads are discarded

    out = pl.pallas_call(
        _head_kernel,
        out_shape=jax.ShapeDtypeStruct((b_pad, LP), jnp.bfloat16),
        grid=(n_steps,),
        in_specs=[
            pl.BlockSpec((tb, H), lambda i: (i, 0)),    # CLS tile (cols 0:H)
            pl.BlockSpec((H, H), lambda i: (0, 0)),     # dense weight, resident
            pl.BlockSpec((1, H), lambda i: (0, 0)),     # dense bias, resident
            pl.BlockSpec((H, LP), lambda i: (0, 0)),    # out_proj weight, resident
            pl.BlockSpec((1, LP), lambda i: (0, 0)),    # out_proj bias, resident
        ],
        out_specs=pl.BlockSpec((tb, LP), lambda i: (i, 0)),
        compiler_params=pltpu.CompilerParams(
            dimension_semantics=("parallel",)),         # shard batch across TCs
    )(x2d, wd_bf16, bd2, wo_pad, bo_pad)

    # Tiny [B, L] slice + cast back to f32 for downstream loss/softmax.
    return out[:B, :L].astype(jnp.float32)


def _ref_forward(features, wd, bd, wo, bo):
    # Reference with matching numerics: bf16 matmul operands, f32 accumulation,
    # f32 bias + tanh.
    x = features[:, 0, :].astype(jnp.bfloat16)
    h = jnp.dot(x, wd.astype(jnp.bfloat16),
                preferred_element_type=jnp.float32) + bd.astype(jnp.float32)
    h = jnp.tanh(h).astype(jnp.bfloat16)
    y = jnp.dot(h, wo.astype(jnp.bfloat16),
                preferred_element_type=jnp.float32) + bo.astype(jnp.float32)
    return y


if __name__ == "__main__":
    # Small shapes consistent with the module; H=128 keeps the hidden dim
    # lane-aligned (real RoBERTa uses H=768/1024, also multiples of 128).
    B, S, H, L = 8, 8, 128, 2

    key = jax.random.PRNGKey(0)
    k_feat, k_wd, k_bd, k_wo, k_bo = jax.random.split(key, 5)

    features = jax.random.normal(k_feat, (B, S, H), dtype=jnp.float32)
    # Deterministic synthetic parameters (module __init__ shapes), stored transposed.
    wd = jax.random.normal(k_wd, (H, H), dtype=jnp.float32) * 0.05   # dense.weight^T
    bd = jax.random.normal(k_bd, (H,), dtype=jnp.float32) * 0.05     # dense.bias
    wo = jax.random.normal(k_wo, (H, L), dtype=jnp.float32) * 0.05   # out_proj.weight^T
    bo = jax.random.normal(k_bo, (L,), dtype=jnp.float32) * 0.05     # out_proj.bias

    params = prepare_head_params(wd, bd, wo, bo)   # one-time weight prep
    out = roberta_classification_head(features, params)
    out = jax.block_until_ready(out)

    ref = _ref_forward(features, wd, bd, wo, bo)
    assert out.shape == (B, L), out.shape
    assert jnp.allclose(out, ref, atol=2e-2, rtol=2e-2), "mismatch vs reference"

    print("KERNEL_OK")
</pallas_src>

<mosaic_0001>
module attributes {stable_mosaic.version = 11 : i64} {
  func.func @_head_kernel(%arg0: i32, %arg1: memref<8x128xf32, #tpu.memory_space<vmem>>, %arg2: memref<128x128xbf16, #tpu.memory_space<vmem>>, %arg3: memref<1x128xf32, #tpu.memory_space<vmem>>, %arg4: memref<128x128xbf16, #tpu.memory_space<vmem>>, %arg5: memref<1x128xf32, #tpu.memory_space<vmem>>, %arg6: memref<8x128xbf16, #tpu.memory_space<vmem>>) attributes {dimension_semantics = [#tpu.dimension_semantics<parallel>], iteration_bounds = array<i64: 1>, scalar_prefetch = 0 : i64, scratch_operands = 0 : i64, tpu.core_type = #tpu.core_type<tc>, window_params = [{transform_indices = @transform_0, window_bounds = array<i64: 8, 128>}, {pipeline_mode = #tpu.pipeline_mode<synchronous>, transform_indices = @transform_1, window_bounds = array<i64: 128, 128>}, {pipeline_mode = #tpu.pipeline_mode<synchronous>, transform_indices = @transform_2, window_bounds = array<i64: 1, 128>}, {pipeline_mode = #tpu.pipeline_mode<synchronous>, transform_indices = @transform_3, window_bounds = array<i64: 128, 128>}, {pipeline_mode = #tpu.pipeline_mode<synchronous>, transform_indices = @transform_4, window_bounds = array<i64: 1, 128>}, {transform_indices = @transform_5, window_bounds = array<i64: 8, 128>}]} {
    %c0 = arith.constant 0 : index
    %c0_0 = arith.constant 0 : index
    %0 = vector.load %arg1[%c0, %c0_0] : memref<8x128xf32, #tpu.memory_space<vmem>>, vector<8x128xf32>
    %1 = arith.truncf %0 : vector<8x128xf32> to vector<8x128xbf16>
    %c0_1 = arith.constant 0 : index
    %c0_2 = arith.constant 0 : index
    %2 = vector.load %arg2[%c0_1, %c0_2] : memref<128x128xbf16, #tpu.memory_space<vmem>>, vector<128x128xbf16>
    %cst = arith.constant dense<0.000000e+00> : vector<8x128xf32>
    %3 = tpu.matmul %1, %2, %cst {dimension_numbers = #tpu.dot_dimension_numbers<[1], [0], [0], [1], [0, 0, 1, 1], [], []>} : vector<8x128xbf16>, vector<128x128xbf16>, vector<8x128xf32> -> vector<8x128xf32>
    %c0_3 = arith.constant 0 : index
    %c0_4 = arith.constant 0 : index
    %4 = vector.load %arg3[%c0_3, %c0_4] : memref<1x128xf32, #tpu.memory_space<vmem>>, vector<1x128xf32>
    %5 = vector.broadcast %4 : vector<1x128xf32> to vector<8x128xf32>
    %6 = arith.addf %3, %5 : vector<8x128xf32>
    %7 = math.tanh %6 : vector<8x128xf32>
    %8 = arith.truncf %7 : vector<8x128xf32> to vector<8x128xbf16>
    %c0_5 = arith.constant 0 : index
    %c0_6 = arith.constant 0 : index
    %9 = vector.load %arg4[%c0_5, %c0_6] : memref<128x128xbf16, #tpu.memory_space<vmem>>, vector<128x128xbf16>
    %cst_7 = arith.constant dense<0.000000e+00> : vector<8x128xf32>
    %10 = tpu.matmul %8, %9, %cst_7 {dimension_numbers = #tpu.dot_dimension_numbers<[1], [0], [0], [1], [0, 0, 1, 1], [], []>} : vector<8x128xbf16>, vector<128x128xbf16>, vector<8x128xf32> -> vector<8x128xf32>
    %c0_8 = arith.constant 0 : index
    %c0_9 = arith.constant 0 : index
    %11 = vector.load %arg5[%c0_8, %c0_9] : memref<1x128xf32, #tpu.memory_space<vmem>>, vector<1x128xf32>
    %12 = vector.broadcast %11 : vector<1x128xf32> to vector<8x128xf32>
    %13 = arith.addf %10, %12 : vector<8x128xf32>
    %14 = arith.truncf %13 : vector<8x128xf32> to vector<8x128xbf16>
    %c0_10 = arith.constant 0 : index
    %c0_11 = arith.constant 0 : index
    %15 = vector.load %arg6[%c0_10, %c0_11] : memref<8x128xbf16, #tpu.memory_space<vmem>>, vector<8x128xbf16>
    tpu.vector_store %arg6[%c0_10, %c0_11], %14 {strides = array<i32>} : memref<8x128xbf16, #tpu.memory_space<vmem>>, vector<8x128xbf16>,
    return
  }
  func.func @transform_0(%arg0: i32) -> (i32, i32) {
    %c0_i32 = arith.constant 0 : i32
    %c0_i32_0 = arith.constant 0 : i32
    return %arg0, %c0_i32 : i32, i32
  }
  func.func @transform_1(%arg0: i32) -> (i32, i32) {
    %c0_i32 = arith.constant 0 : i32
    %c0_i32_0 = arith.constant 0 : i32
    %c0_i32_1 = arith.constant 0 : i32
    return %c0_i32, %c0_i32_0 : i32, i32
  }
  func.func @transform_2(%arg0: i32) -> (i32, i32) {
    %c0_i32 = arith.constant 0 : i32
    %c0_i32_0 = arith.constant 0 : i32
    %c0_i32_1 = arith.constant 0 : i32
    return %c0_i32, %c0_i32_0 : i32, i32
  }
  func.func @transform_3(%arg0: i32) -> (i32, i32) {
    %c0_i32 = arith.constant 0 : i32
    %c0_i32_0 = arith.constant 0 : i32
    %c0_i32_1 = arith.constant 0 : i32
    return %c0_i32, %c0_i32_0 : i32, i32
  }
  func.func @transform_4(%arg0: i32) -> (i32, i32) {
    %c0_i32 = arith.constant 0 : i32
    %c0_i32_0 = arith.constant 0 : i32
    %c0_i32_1 = arith.constant 0 : i32
    return %c0_i32, %c0_i32_0 : i32, i32
  }
  func.func @transform_5(%arg0: i32) -> (i32, i32) {
    %c0_i32 = arith.constant 0 : i32
    %c0_i32_0 = arith.constant 0 : i32
    return %arg0, %c0_i32 : i32, i32
  }
}

</mosaic_0001>

<bundles_post_ra>
// kernel: tpu_custom_call.1
= control target key start
LH: loop header
LB: loop body
LE: loop exit
PB: predicated region body
PF: predicated region fallthrough
CT: control target
= control target key end

     0   :  { %10 = vsyncpa [#allocation3], 0  ;;  %s602_s0 = inlined_call_operand.hbm [shape: f32[8,1024], index: 0, kind: input, shape index: {}]   ;;  %s603_s1 = inlined_call_operand.hbm [shape: bf16[128,128], index: 1, kind: input, shape index: {}]   ;;  %s604_s2 = inlined_call_operand.vmem [shape: f32[1,128], index: 2, kind: input, shape index: {}]   ;;  %s605_s3 = inlined_call_operand.hbm [shape: bf16[128,128], index: 3, kind: input, shape index: {}]   ;;  %s606_s4 = inlined_call_operand.vmem [shape: f32[1,128], index: 4, kind: input, shape index: {}]   ;;  %s607_s5 = inlined_call_operand.hbm [shape: bf16[8,128], index: 5, kind: output, shape index: {}]  }
   0x1   :  { %11 = vsyncpa [#allocation6], 0 }
   0x2   :  { %12 = vsyncpa [#allocation4], 0  ;;  %s501_s18 = smov [#allocation5]   ;;  %s407_s22 = scalar_lea.hbm %s603_s1, 1024 }
   0x3   :  { %s28_s19 = sshll.u32 %s501_s18, 4  ;;  %p408_p0 = scmp.ne.s32.totalorder %s603_s1, %s407_s22  ;;  %s29_s19 = int_to_ptr.vmem [resolvable:$true] %s28_s19 }
   0x4   :  { %p411_p1 = scmp.lt.u32.totalorder %s407_s22, %s603_s1 }
   0x6   :  { %p413_p2 = pnand %p411_p1, %p408_p0 }
   0x8   :  { %416 = shalt.err (!%p413_p2)
}
   0x9   :  { %s417_s27 = scalar_lea.vmem %s29_s19, 1024  ;;  %p422_p4 = scmp.lt.s32.totalorder %s29_s19, %s29_s19 }
   0xa   :  { %p418_p3 = scmp.ne.s32.totalorder %s29_s19, %s417_s27  ;;  %p423_p5 = scmp.lt.s32.totalorder %s417_s27, %s417_s27 }
   0xc   :  { %p424_p6 = por %p423_p5, %p422_p4 }
   0xe   :  { %p425_p7 = pnand %p424_p6, %p418_p3 }
  0x10   :  { %428 = shalt.err (!%p425_p7)
}
  0x11   :  { %s502_s28 = smov 64   ;;  %s503_s29 = smov 4  }
  0x12   :  { %34 = dma.hbm_to_vmem [thread:$0]  %s603_s1, 1024, %s29_s19, [#allocation6], %s502_s28, %s502_s28, %s503_s29  }
  0x13   :  { %s504_s7 = smov [#allocation2]   ;;  %s505_s9 = smov [#allocation7]  }
  0x14   :  { %s19_s8 = sshll.u32 %s504_s7, 4  ;;  %s42_s10 = sshll.u32 %s505_s9, 4  ;;  %s20_s8 = int_to_ptr.vmem [resolvable:$true] %s19_s8  ;;  %s43_s10 = int_to_ptr.vmem [resolvable:$true] %s42_s10 }
  0x15   :  { %s429_s13 = scalar_lea.hbm %s602_s0, 128  ;;  %s431_s18 = scalar_lea.hbm %s602_s0, 1024 }
  0x16   :  { %p430_p8 = scmp.ne.s32.totalorder %s602_s0, %s429_s13  ;;  %p432_p9 = scmp.lt.u32.totalorder %s431_s18, %s429_s13 }
  0x17   :  { %p433_p10 = scmp.lt.u32.totalorder %s429_s13, %s602_s0 }
  0x19   :  { %p434_p11 = por %p433_p10, %p432_p9 }
  0x1b   :  { %p435_p12 = pnand %p434_p11, %p430_p8 }
  0x1d   :  { %438 = shalt.err (!%p435_p12)
}
  0x1e   :  { %s439_s19 = scalar_lea.vmem %s20_s8, 128  ;;  %p444_p0 = scmp.lt.s32.totalorder %s20_s8, %s20_s8 }
  0x1f   :  { %p440_p13 = scmp.ne.s32.totalorder %s20_s8, %s439_s19  ;;  %p445_p1 = scmp.lt.s32.totalorder %s439_s19, %s439_s19 }
  0x21   :  { %p446_p2 = por %p445_p1, %p444_p0 }
  0x23   :  { %p447_p3 = pnand %p446_p2, %p440_p13 }
  0x25   :  { %450 = shalt.err (!%p447_p3)
}
  0x26   :  { %22 = dma.hbm_to_vmem [thread:$0]  %s602_s0, 128, %s20_s8, [#allocation3]  }
  0x27   :  { %s451_s25 = scalar_lea.hbm %s605_s3, 1024 }
  0x28   :  { %p452_p4 = scmp.ne.s32.totalorder %s605_s3, %s451_s25  ;;  %p455_p5 = scmp.lt.u32.totalorder %s451_s25, %s605_s3 }
  0x2a   :  { %p457_p6 = pnand %p455_p5, %p452_p4 }
  0x2c   :  { %460 = shalt.err (!%p457_p6)
}
  0x2d   :  { %s461_s7 = scalar_lea.vmem %s43_s10, 1024  ;;  %p466_p8 = scmp.lt.s32.totalorder %s43_s10, %s43_s10 }
  0x2e   :  { %p462_p7 = scmp.ne.s32.totalorder %s43_s10, %s461_s7  ;;  %p467_p9 = scmp.lt.s32.totalorder %s461_s7, %s461_s7 }
  0x30   :  { %p468_p10 = por %p467_p9, %p466_p8 }
  0x32   :  { %p469_p11 = pnand %p468_p10, %p462_p7 }
  0x34   :  { %472 = shalt.err (!%p469_p11)
}
  0x35   :  { %48 = dma.hbm_to_vmem [thread:$0]  %s605_s3, 1024, %s43_s10, [#allocation6], %s502_s28, %s502_s28, %s503_s29  }
  0x36   :  { %495 = dma.done.wait [#allocation3], 128  }
  0x37   :  { %496 = vsyncadd [#allocation3], 4294967168 }
  0x38   :  { %497 = dma.done.wait [#allocation6], 2048  }
  0x39   :  { %498 = vsyncadd [#allocation6], 4294965248  ;;  %v506_v0 = vmov 0.0   ;;  %vm507_vm0 = vmmov 0   ;;  %v389_v1 = vld [vmem:[#allocation5] sm:$0xff]   ;;  %v390_v2 = vld [vmem:[#allocation5 + $0x8] sm:$0xff]  }
  0x3a   :  { %341 = vmatprep.subr.bf16.mxu0 %v506_v0  ;;  %357 = vmatprep.mubr.msk.bf16.mxu0 %vm507_vm0, %v506_v0  ;;  %v391_v3 = vld [vmem:[#allocation5 + $0x10] sm:$0xff]   ;;  %v397_v4 = vld [vmem:[#allocation7] sm:$0xff]   ;;  %v392_v5 = vld [vmem:[#allocation5 + $0x18] sm:$0xff]   ;;  %s508_s10 = smov [#allocation8]  }
  0x3b   :  { %361 = vmatprep.subr.bf16.mxu1 %v506_v0  ;;  %377 = vmatprep.mubr.msk.bf16.mxu1 %vm507_vm0, %v506_v0  ;;  %v398_v6 = vld [vmem:[#allocation7 + $0x8] sm:$0xff]   ;;  %v393_v7 = vld [vmem:[#allocation5 + $0x20] sm:$0xff]   ;;  %v399_v8 = vld [vmem:[#allocation7 + $0x10] sm:$0xff]   ;;  %s295_s11 = sshll.u32 %s508_s10, 4  ;;  %s296_s11 = int_to_ptr.vmem [resolvable:$true] %s295_s11 }
  0x3c   :  { %342 = vmatpush3.bf16.msra.mxu0 %v389_v1  ;;  %362 = vmatpush3.bf16.msra.mxu1 %v397_v4  ;;  %v394_v9 = vld [vmem:[#allocation5 + $0x28] sm:$0xff]   ;;  %v400_v10 = vld [vmem:[#allocation7 + $0x18] sm:$0xff]   ;;  %v395_v11 = vld [vmem:[#allocation5 + $0x30] sm:$0xff]   ;;  %p478_p13 = scmp.lt.s32.totalorder %s296_s11, %s296_s11 }
  0x3d   :  { %343 = vmatprep.subr.bf16.mxu0 %v506_v0  ;;  %363 = vmatprep.subr.bf16.mxu1 %v506_v0  ;;  %v396_v12 = vld [vmem:[#allocation5 + $0x38] sm:$0xff]   ;;  %v401_v15 = vld [vmem:[#allocation7 + $0x20] sm:$0xff]   ;;  %v402_v16 = vld [vmem:[#allocation7 + $0x28] sm:$0xff]  }
  0x3e   :  { %v61_v13 = vld [vmem:[#allocation2] sm:$0xff]  ;;  %v403_v17 = vld [vmem:[#allocation7 + $0x30] sm:$0xff]  }
  0x3f   :  { %v62_v14 = vpack.c.bf16 %v61_v13, %v61_v13  ;;  %v404_v18 = vld [vmem:[#allocation7 + $0x38] sm:$0xff]  }
  0x40   :  { %344 = vmatpush3.bf16.msra.mxu0 %v390_v2  ;;  %364 = vmatpush3.bf16.msra.mxu1 %v398_v6  ;;  %v305_v19 = vld [vmem:[%s604_s2] ss:$0 sm:$0xff]  ;;  %s473_s2 = scalar_lea.vmem %s296_s11, 64 }
  0x41   :  { %345 = vmatprep.subr.bf16.mxu0 %v506_v0  ;;  %365 = vmatprep.subr.bf16.mxu1 %v506_v0  ;;  %v314_v27 = vld [vmem:[%s606_s4] ss:$0 sm:$0xff]  ;;  %p474_p12 = scmp.ne.s32.totalorder %s296_s11, %s473_s2  ;;  %p479_p0 = scmp.lt.s32.totalorder %s473_s2, %s473_s2 }
  0x43   :  { %p480_p1 = por %p479_p0, %p478_p13 }
  0x44   :  { %346 = vmatpush3.bf16.msra.mxu0 %v391_v3  ;;  %366 = vmatpush3.bf16.msra.mxu1 %v399_v8 }
  0x45   :  { %347 = vmatprep.subr.bf16.mxu0 %v506_v0  ;;  %367 = vmatprep.subr.bf16.mxu1 %v506_v0  ;;  %p481_p2 = pnand %p480_p1, %p474_p12 }
  0x48   :  { %348 = vmatpush3.bf16.msra.mxu0 %v392_v5  ;;  %368 = vmatpush3.bf16.msra.mxu1 %v400_v10 }
  0x49   :  { %349 = vmatprep.subr.bf16.mxu0 %v506_v0  ;;  %369 = vmatprep.subr.bf16.mxu1 %v506_v0 }
  0x4c   :  { %350 = vmatpush3.bf16.msra.mxu0 %v393_v7  ;;  %370 = vmatpush3.bf16.msra.mxu1 %v401_v15 }
  0x4d   :  { %351 = vmatprep.subr.bf16.mxu0 %v506_v0  ;;  %371 = vmatprep.subr.bf16.mxu1 %v506_v0 }
  0x50   :  { %352 = vmatpush3.bf16.msra.mxu0 %v394_v9  ;;  %372 = vmatpush3.bf16.msra.mxu1 %v402_v16 }
  0x51   :  { %353 = vmatprep.subr.bf16.mxu0 %v506_v0  ;;  %373 = vmatprep.subr.bf16.mxu1 %v506_v0 }
  0x54   :  { %354 = vmatpush3.bf16.msra.mxu0 %v395_v11  ;;  %374 = vmatpush3.bf16.msra.mxu1 %v403_v17 }
  0x55   :  { %355 = vmatprep.subr.bf16.mxu0 %v506_v0  ;;  %375 = vmatprep.subr.bf16.mxu1 %v506_v0 }
  0x58   :  { %356 = vmatpush3.bf16.msra.mxu0 %v396_v12  ;;  %376 = vmatpush3.bf16.msra.mxu1 %v404_v18 }
  0x5b   :  { %358 = vmatmul.mubr.bf16.vlgmr.msra.gmra.mrb[0].mxu0 %v62_v14 }
 0x12e   :  { %v168_v20 = vpop.f32.mrb[0].mxu0 }
 0x12f   :  { %v169_v21 = vadd.f32 %v305_v19, %v168_v20  ;;  %v359_v22 = vpop.f32.mrb[1].mxu0 }
 0x130   :  { %v171_v23 = vpop.f32.mrb[2].mxu0 }
 0x131   :  { %405 = vtanh.f32 %v169_v21  ;;  %v360_v24 = vpop.f32.mrb[3].mxu0 }
 0x13b   :  { %v406_v25 = vpop.eup %405 }
 0x13c   :  { %v175_v26 = vpack.c.bf16 %v406_v25, %v406_v25 }
 0x13e   :  { %378 = vmatmul.mubr.bf16.vlgmr.msra.gmra.mrb[0].mxu1 %v175_v26 }
 0x211   :  { %v281_v28 = vpop.f32.mrb[0].mxu1 }
 0x212   :  { %v282_v29 = vadd.f32 %v314_v27, %v281_v28  ;;  %v379_v30 = vpop.f32.mrb[1].mxu1 }
 0x213   :  { %v284_v31 = vpop.f32.mrb[2].mxu1 }
 0x214   :  { %v287_v32 = vpack.c.bf16 %v282_v29, %v282_v29  ;;  %v380_v33 = vpop.f32.mrb[3].mxu1 }
 0x216   :  { %288 = vst [vmem:[#allocation8] sm:$0xf] %v287_v32 }
 0x217   :  { %484 = shalt.err (!%p481_p2)
}
 0x218   :  { %s485_s4 = scalar_lea.hbm %s607_s5, 64 }
 0x219   :  { %p486_p3 = scmp.ne.s32.totalorder %s607_s5, %s485_s4  ;;  %p489_p4 = scmp.lt.u32.totalorder %s485_s4, %s607_s5 }
 0x21b   :  { %p491_p5 = pnand %p489_p4, %p486_p3 }
 0x21d   :  { %494 = shalt.err (!%p491_p5)
}
 0x21e   :  { %298 = dma.vmem_to_hbm [thread:$0]  %s296_s11, 64, %s607_s5, [#allocation4]  }
 0x21f   :  { %499 = dma.done.wait [#allocation4], 64  }
 0x220   :  { %500 = vsyncadd [#allocation4], 4294967232 }
 0x221   :  { %302 = vsyncpa [#allocation3], 1 }
 0x222   :  { %303 = vsyncpa [#allocation6], 1 }
 0x223   :  { %304 = vsyncpa [#allocation4], 1 }

</bundles_post_ra>
